<compile_context>
chip_gen: v7x
topology: tpu7x:2x2x1
jax: 0.10.0
libtpu: 0.0.40
codegen_flags: <defaults>
</compile_context>

<pallas_src>
import functools

import jax
import jax.numpy as jnp
from jax.experimental import pallas as pl
from jax.experimental.pallas import tpu as pltpu

LN_EPS = 1e-5  # torch.nn.LayerNorm default


def _round_up(x, m):
    return (x + m - 1) // m * m


def _pad2d(a, rows, cols):
    return jnp.pad(a, ((0, rows - a.shape[0]), (0, cols - a.shape[1])))


def _fused_mlp_kernel(n_hidden, true_hidden_dims, *refs):
    """Whole MLP in one kernel.

    refs = (x_ref, [w, b, gamma, beta] * n_hidden, w_final, b_final, o_ref).
    Feature dims are zero-padded to 128-lane multiples; LayerNorm uses the true
    width for mean/var and masks padded lanes, and gamma/beta pads are zero so
    padded lanes stay 0 through ReLU and the next matmul.
    """
    x_ref = refs[0]
    o_ref = refs[-1]
    prefs = refs[1:-1]

    h = x_ref[...]
    for l in range(n_hidden):
        w_ref, b_ref, g_ref, beta_ref = prefs[4 * l:4 * l + 4]
        # Linear: (TM, In_p) @ (In_p, H_p) + (1, H_p) on the MXU, f32 accumulate.
        y = jnp.dot(h, w_ref[...], preferred_element_type=jnp.float32) + b_ref[...]

        true_h = true_hidden_dims[l]
        padded_h = y.shape[-1]
        inv_h = 1.0 / true_h
        # Padded lanes of y are exactly 0 (zero-padded weights/bias), so the raw
        # sum already equals the sum over the true features.
        mean = jnp.sum(y, axis=-1, keepdims=True) * inv_h
        diff = y - mean
        if padded_h != true_h:
            lane = jax.lax.broadcasted_iota(jnp.int32, y.shape, 1)
            diff = jnp.where(lane < true_h, diff, 0.0)
        var = jnp.sum(diff * diff, axis=-1, keepdims=True) * inv_h
        y = diff * jax.lax.rsqrt(var + LN_EPS) * g_ref[...] + beta_ref[...]
        h = jnp.maximum(y, 0.0)
        # TODO(synk): Dropout(0.1) is identity in eval mode; training-mode masking not emitted.

    wf_ref, bf_ref = prefs[4 * n_hidden], prefs[4 * n_hidden + 1]
    y = jnp.dot(h, wf_ref[...], preferred_element_type=jnp.float32) + bf_ref[...]
    o_ref[...] = y.astype(o_ref.dtype)


@functools.partial(jax.jit, static_argnames=("num_keypoints", "output_dim", "batch_tile"))
def mlp_regressor_forward(params, x, *, num_keypoints, output_dim, batch_tile=256):
    hidden = params["hidden"]
    wf, bf = params["final_w"], params["final_b"]

    B, d_in = x.shape
    true_hidden = tuple(int(w.shape[1]) for (w, _, _, _) in hidden)
    d_out = num_keypoints * output_dim

    # Lane-pad every feature dim to a multiple of 128; sublane-pad batch to TM.
    d_in_p = _round_up(d_in, 128)
    hid_p = tuple(_round_up(h, 128) for h in true_hidden)
    d_out_p = _round_up(d_out, 128)

    tm = min(batch_tile, _round_up(B, 8))     # keep tiles modest for v7x's 64 MiB VMEM
    b_p = _round_up(B, tm)
    grid = (b_p // tm,)

    x_p = jnp.pad(x, ((0, b_p - B), (0, d_in_p - d_in)))

    inputs = [x_p]
    in_specs = [pl.BlockSpec((tm, d_in_p), lambda i: (i, 0))]

    prev_p = d_in_p
    for (w, b, g, beta), hp in zip(hidden, hid_p):
        inputs += [_pad2d(w, prev_p, hp), _pad2d(b, 1, hp),
                   _pad2d(g, 1, hp), _pad2d(beta, 1, hp)]
        # Constant index_maps: parameters stay resident in VMEM across batch tiles.
        in_specs += [pl.BlockSpec((prev_p, hp), lambda i: (0, 0)),
                     pl.BlockSpec((1, hp), lambda i: (0, 0)),
                     pl.BlockSpec((1, hp), lambda i: (0, 0)),
                     pl.BlockSpec((1, hp), lambda i: (0, 0))]
        prev_p = hp
    inputs += [_pad2d(wf, prev_p, d_out_p), _pad2d(bf, 1, d_out_p)]
    in_specs += [pl.BlockSpec((prev_p, d_out_p), lambda i: (0, 0)),
                 pl.BlockSpec((1, d_out_p), lambda i: (0, 0))]

    out_specs = pl.BlockSpec((tm, d_out_p), lambda i: (i, 0))

    # Advisory cost estimate so XLA can schedule around the fused custom call.
    dims = (d_in_p,) + hid_p + (d_out_p,)
    flops = 2 * b_p * sum(a * c for a, c in zip(dims[:-1], dims[1:]))
    param_bytes = 4 * sum(int(p.size) for p in inputs[1:])
    bytes_acc = 4 * (int(x_p.size) + b_p * d_out_p) + param_bytes
    cost = pl.CostEstimate(flops=flops,
                           transcendentals=b_p * len(hidden),
                           bytes_accessed=bytes_acc)

    kernel = functools.partial(_fused_mlp_kernel, len(hidden), true_hidden)
    out_p = pl.pallas_call(
        kernel,
        out_shape=jax.ShapeDtypeStruct((b_p, d_out_p), jnp.float32),
        grid=grid,
        in_specs=in_specs,
        out_specs=out_specs,
        compiler_params=pltpu.CompilerParams(
            dimension_semantics=("parallel",)),
        cost_estimate=cost,
    )(*inputs)

    # Slice off batch/lane padding, then reshape like PyTorch's .view.
    out = out_p[:B, :d_out]
    return out.reshape(-1, num_keypoints, output_dim)


def init_mlp_regressor_params(key, input_dim, hidden_dims, num_keypoints, output_dim=3):
    """Deterministic parameter init mirroring the nn.Linear / nn.LayerNorm shapes.

    Linear weights are stored pre-transposed as (in_dim, out_dim) so the kernel
    computes x @ W + b directly on the MXU.  Only arrays go in the pytree.
    """
    params = {"hidden": []}
    prev = input_dim
    for h in hidden_dims:
        key, k_w, k_b = jax.random.split(key, 3)
        bound = 1.0 / jnp.sqrt(prev)
        w = jax.random.uniform(k_w, (prev, h), jnp.float32, -bound, bound)
        b = jax.random.uniform(k_b, (1, h), jnp.float32, -bound, bound)
        gamma = jnp.ones((1, h), jnp.float32)
        beta = jnp.zeros((1, h), jnp.float32)
        params["hidden"].append((w, b, gamma, beta))
        prev = h
    key, k_w, k_b = jax.random.split(key, 3)
    out_dim_total = num_keypoints * output_dim
    bound = 1.0 / jnp.sqrt(prev)
    params["final_w"] = jax.random.uniform(k_w, (prev, out_dim_total), jnp.float32, -bound, bound)
    params["final_b"] = jax.random.uniform(k_b, (1, out_dim_total), jnp.float32, -bound, bound)
    return params


def reference_forward(params, x, num_keypoints, output_dim):
    """Plain-JAX reference (high-precision matmuls) for correctness checking."""
    h = x
    for (w, b, gamma, beta) in params["hidden"]:
        y = jnp.dot(h, w, precision=jax.lax.Precision.HIGHEST) + b
        mean = jnp.mean(y, axis=-1, keepdims=True)
        var = jnp.mean((y - mean) ** 2, axis=-1, keepdims=True)
        y = (y - mean) / jnp.sqrt(var + LN_EPS) * gamma + beta
        h = jnp.maximum(y, 0.0)
    out = jnp.dot(h, params["final_w"], precision=jax.lax.Precision.HIGHEST) + params["final_b"]
    return out.reshape(-1, num_keypoints, output_dim)


if __name__ == "__main__":
    key = jax.random.PRNGKey(0)

    batch = 8
    input_dim = 32
    hidden_dims = [64, 32]
    num_keypoints = 4
    output_dim = 3

    key, k_params, k_x = jax.random.split(key, 3)
    params = init_mlp_regressor_params(k_params, input_dim, hidden_dims,
                                       num_keypoints, output_dim)
    x = jax.random.normal(k_x, (batch, input_dim), jnp.float32)

    out = mlp_regressor_forward(params, x,
                                num_keypoints=num_keypoints,
                                output_dim=output_dim)
    out = jax.block_until_ready(out)

    ref = reference_forward(params, x, num_keypoints, output_dim)
    assert out.shape == (batch, num_keypoints, output_dim), out.shape
    assert jnp.allclose(out, ref, atol=2e-3, rtol=2e-3), "mismatch vs reference"

    print("KERNEL_OK")
</pallas_src>

<mosaic_0001>
module attributes {stable_mosaic.version = 11 : i64} {
  func.func @_fused_mlp_kernel(%arg0: i32, %arg1: memref<8x128xf32, #tpu.memory_space<vmem>>, %arg2: memref<128x128xf32, #tpu.memory_space<vmem>>, %arg3: memref<1x128xf32, #tpu.memory_space<vmem>>, %arg4: memref<1x128xf32, #tpu.memory_space<vmem>>, %arg5: memref<1x128xf32, #tpu.memory_space<vmem>>, %arg6: memref<128x128xf32, #tpu.memory_space<vmem>>, %arg7: memref<1x128xf32, #tpu.memory_space<vmem>>, %arg8: memref<1x128xf32, #tpu.memory_space<vmem>>, %arg9: memref<1x128xf32, #tpu.memory_space<vmem>>, %arg10: memref<128x128xf32, #tpu.memory_space<vmem>>, %arg11: memref<1x128xf32, #tpu.memory_space<vmem>>, %arg12: memref<8x128xf32, #tpu.memory_space<vmem>>) attributes {dimension_semantics = [#tpu.dimension_semantics<parallel>], iteration_bounds = array<i64: 1>, scalar_prefetch = 0 : i64, scratch_operands = 0 : i64, tpu.core_type = #tpu.core_type<tc>, window_params = [{transform_indices = @transform_0, window_bounds = array<i64: 8, 128>}, {pipeline_mode = #tpu.pipeline_mode<synchronous>, transform_indices = @transform_1, window_bounds = array<i64: 128, 128>}, {pipeline_mode = #tpu.pipeline_mode<synchronous>, transform_indices = @transform_2, window_bounds = array<i64: 1, 128>}, {pipeline_mode = #tpu.pipeline_mode<synchronous>, transform_indices = @transform_3, window_bounds = array<i64: 1, 128>}, {pipeline_mode = #tpu.pipeline_mode<synchronous>, transform_indices = @transform_4, window_bounds = array<i64: 1, 128>}, {pipeline_mode = #tpu.pipeline_mode<synchronous>, transform_indices = @transform_5, window_bounds = array<i64: 128, 128>}, {pipeline_mode = #tpu.pipeline_mode<synchronous>, transform_indices = @transform_6, window_bounds = array<i64: 1, 128>}, {pipeline_mode = #tpu.pipeline_mode<synchronous>, transform_indices = @transform_7, window_bounds = array<i64: 1, 128>}, {pipeline_mode = #tpu.pipeline_mode<synchronous>, transform_indices = @transform_8, window_bounds = array<i64: 1, 128>}, {pipeline_mode = #tpu.pipeline_mode<synchronous>, transform_indices = @transform_9, window_bounds = array<i64: 128, 128>}, {pipeline_mode = #tpu.pipeline_mode<synchronous>, transform_indices = @transform_10, window_bounds = array<i64: 1, 128>}, {transform_indices = @transform_11, window_bounds = array<i64: 8, 128>}]} {
    %c0 = arith.constant 0 : index
    %c0_0 = arith.constant 0 : index
    %0 = vector.load %arg1[%c0, %c0_0] : memref<8x128xf32, #tpu.memory_space<vmem>>, vector<8x128xf32>
    %c0_1 = arith.constant 0 : index
    %c0_2 = arith.constant 0 : index
    %1 = vector.load %arg2[%c0_1, %c0_2] : memref<128x128xf32, #tpu.memory_space<vmem>>, vector<128x128xf32>
    %cst = arith.constant dense<0.000000e+00> : vector<8x128xf32>
    %2 = tpu.matmul %0, %1, %cst {dimension_numbers = #tpu.dot_dimension_numbers<[1], [0], [0], [1], [0, 0, 1, 1], [], []>} : vector<8x128xf32>, vector<128x128xf32>, vector<8x128xf32> -> vector<8x128xf32>
    %c0_3 = arith.constant 0 : index
    %c0_4 = arith.constant 0 : index
    %3 = vector.load %arg3[%c0_3, %c0_4] : memref<1x128xf32, #tpu.memory_space<vmem>>, vector<1x128xf32>
    %4 = vector.broadcast %3 : vector<1x128xf32> to vector<8x128xf32>
    %5 = arith.addf %2, %4 : vector<8x128xf32>
    %cst_5 = arith.constant dense<0.000000e+00> : vector<8xf32>
    %6 = vector.multi_reduction <add>, %5, %cst_5 [1] : vector<8x128xf32> to vector<8xf32>
    %7 = vector.shape_cast %6 : vector<8xf32> to vector<8x1xf32>
    %cst_6 = arith.constant 1.562500e-02 : f32
    %8 = vector.broadcast %cst_6 : f32 to vector<8x1xf32>
    %9 = arith.mulf %7, %8 : vector<8x1xf32>
    %10 = vector.broadcast %9 : vector<8x1xf32> to vector<8x128xf32>
    %11 = arith.subf %5, %10 : vector<8x128xf32>
    %12 = tpu.iota {dimensions = array<i32: 1>} : vector<8x128xi32>
    %c64_i32 = arith.constant 64 : i32
    %13 = vector.broadcast %c64_i32 : i32 to vector<8x128xi32>
    %14 = arith.cmpi slt, %12, %13 : vector<8x128xi32>
    %cst_7 = arith.constant 0.000000e+00 : f32
    %15 = vector.broadcast %cst_7 : f32 to vector<8x128xf32>
    %16 = arith.select %14, %11, %15 : vector<8x128xi1>, vector<8x128xf32>
    %17 = arith.mulf %16, %16 : vector<8x128xf32>
    %cst_8 = arith.constant dense<0.000000e+00> : vector<8xf32>
    %18 = vector.multi_reduction <add>, %17, %cst_8 [1] : vector<8x128xf32> to vector<8xf32>
    %19 = vector.shape_cast %18 : vector<8xf32> to vector<8x1xf32>
    %cst_9 = arith.constant 1.562500e-02 : f32
    %20 = vector.broadcast %cst_9 : f32 to vector<8x1xf32>
    %21 = arith.mulf %19, %20 : vector<8x1xf32>
    %cst_10 = arith.constant 9.99999974E-6 : f32
    %22 = vector.broadcast %cst_10 : f32 to vector<8x1xf32>
    %23 = arith.addf %21, %22 : vector<8x1xf32>
    %24 = math.rsqrt %23 : vector<8x1xf32>
    %25 = vector.broadcast %24 : vector<8x1xf32> to vector<8x128xf32>
    %26 = arith.mulf %16, %25 : vector<8x128xf32>
    %c0_11 = arith.constant 0 : index
    %c0_12 = arith.constant 0 : index
    %27 = vector.load %arg4[%c0_11, %c0_12] : memref<1x128xf32, #tpu.memory_space<vmem>>, vector<1x128xf32>
    %28 = vector.broadcast %27 : vector<1x128xf32> to vector<8x128xf32>
    %29 = arith.mulf %26, %28 : vector<8x128xf32>
    %c0_13 = arith.constant 0 : index
    %c0_14 = arith.constant 0 : index
    %30 = vector.load %arg5[%c0_13, %c0_14] : memref<1x128xf32, #tpu.memory_space<vmem>>, vector<1x128xf32>
    %31 = vector.broadcast %30 : vector<1x128xf32> to vector<8x128xf32>
    %32 = arith.addf %29, %31 : vector<8x128xf32>
    %cst_15 = arith.constant 0.000000e+00 : f32
    %33 = vector.broadcast %cst_15 : f32 to vector<8x128xf32>
    %34 = arith.maximumf %32, %33 : vector<8x128xf32>
    %c0_16 = arith.constant 0 : index
    %c0_17 = arith.constant 0 : index
    %35 = vector.load %arg6[%c0_16, %c0_17] : memref<128x128xf32, #tpu.memory_space<vmem>>, vector<128x128xf32>
    %cst_18 = arith.constant dense<0.000000e+00> : vector<8x128xf32>
    %36 = tpu.matmul %34, %35, %cst_18 {dimension_numbers = #tpu.dot_dimension_numbers<[1], [0], [0], [1], [0, 0, 1, 1], [], []>} : vector<8x128xf32>, vector<128x128xf32>, vector<8x128xf32> -> vector<8x128xf32>
    %c0_19 = arith.constant 0 : index
    %c0_20 = arith.constant 0 : index
    %37 = vector.load %arg7[%c0_19, %c0_20] : memref<1x128xf32, #tpu.memory_space<vmem>>, vector<1x128xf32>
    %38 = vector.broadcast %37 : vector<1x128xf32> to vector<8x128xf32>
    %39 = arith.addf %36, %38 : vector<8x128xf32>
    %cst_21 = arith.constant dense<0.000000e+00> : vector<8xf32>
    %40 = vector.multi_reduction <add>, %39, %cst_21 [1] : vector<8x128xf32> to vector<8xf32>
    %41 = vector.shape_cast %40 : vector<8xf32> to vector<8x1xf32>
    %cst_22 = arith.constant 3.125000e-02 : f32
    %42 = vector.broadcast %cst_22 : f32 to vector<8x1xf32>
    %43 = arith.mulf %41, %42 : vector<8x1xf32>
    %44 = vector.broadcast %43 : vector<8x1xf32> to vector<8x128xf32>
    %45 = arith.subf %39, %44 : vector<8x128xf32>
    %46 = tpu.iota {dimensions = array<i32: 1>} : vector<8x128xi32>
    %c32_i32 = arith.constant 32 : i32
    %47 = vector.broadcast %c32_i32 : i32 to vector<8x128xi32>
    %48 = arith.cmpi slt, %46, %47 : vector<8x128xi32>
    %cst_23 = arith.constant 0.000000e+00 : f32
    %49 = vector.broadcast %cst_23 : f32 to vector<8x128xf32>
    %50 = arith.select %48, %45, %49 : vector<8x128xi1>, vector<8x128xf32>
    %51 = arith.mulf %50, %50 : vector<8x128xf32>
    %cst_24 = arith.constant dense<0.000000e+00> : vector<8xf32>
    %52 = vector.multi_reduction <add>, %51, %cst_24 [1] : vector<8x128xf32> to vector<8xf32>
    %53 = vector.shape_cast %52 : vector<8xf32> to vector<8x1xf32>
    %cst_25 = arith.constant 3.125000e-02 : f32
    %54 = vector.broadcast %cst_25 : f32 to vector<8x1xf32>
    %55 = arith.mulf %53, %54 : vector<8x1xf32>
    %cst_26 = arith.constant 9.99999974E-6 : f32
    %56 = vector.broadcast %cst_26 : f32 to vector<8x1xf32>
    %57 = arith.addf %55, %56 : vector<8x1xf32>
    %58 = math.rsqrt %57 : vector<8x1xf32>
    %59 = vector.broadcast %58 : vector<8x1xf32> to vector<8x128xf32>
    %60 = arith.mulf %50, %59 : vector<8x128xf32>
    %c0_27 = arith.constant 0 : index
    %c0_28 = arith.constant 0 : index
    %61 = vector.load %arg8[%c0_27, %c0_28] : memref<1x128xf32, #tpu.memory_space<vmem>>, vector<1x128xf32>
    %62 = vector.broadcast %61 : vector<1x128xf32> to vector<8x128xf32>
    %63 = arith.mulf %60, %62 : vector<8x128xf32>
    %c0_29 = arith.constant 0 : index
    %c0_30 = arith.constant 0 : index
    %64 = vector.load %arg9[%c0_29, %c0_30] : memref<1x128xf32, #tpu.memory_space<vmem>>, vector<1x128xf32>
    %65 = vector.broadcast %64 : vector<1x128xf32> to vector<8x128xf32>
    %66 = arith.addf %63, %65 : vector<8x128xf32>
    %cst_31 = arith.constant 0.000000e+00 : f32
    %67 = vector.broadcast %cst_31 : f32 to vector<8x128xf32>
    %68 = arith.maximumf %66, %67 : vector<8x128xf32>
    %c0_32 = arith.constant 0 : index
    %c0_33 = arith.constant 0 : index
    %69 = vector.load %arg10[%c0_32, %c0_33] : memref<128x128xf32, #tpu.memory_space<vmem>>, vector<128x128xf32>
    %cst_34 = arith.constant dense<0.000000e+00> : vector<8x128xf32>
    %70 = tpu.matmul %68, %69, %cst_34 {dimension_numbers = #tpu.dot_dimension_numbers<[1], [0], [0], [1], [0, 0, 1, 1], [], []>} : vector<8x128xf32>, vector<128x128xf32>, vector<8x128xf32> -> vector<8x128xf32>
    %c0_35 = arith.constant 0 : index
    %c0_36 = arith.constant 0 : index
    %71 = vector.load %arg11[%c0_35, %c0_36] : memref<1x128xf32, #tpu.memory_space<vmem>>, vector<1x128xf32>
    %72 = vector.broadcast %71 : vector<1x128xf32> to vector<8x128xf32>
    %73 = arith.addf %70, %72 : vector<8x128xf32>
    %c0_37 = arith.constant 0 : index
    %c0_38 = arith.constant 0 : index
    %74 = vector.load %arg12[%c0_37, %c0_38] : memref<8x128xf32, #tpu.memory_space<vmem>>, vector<8x128xf32>
    tpu.vector_store %arg12[%c0_37, %c0_38], %73 {strides = array<i32>} : memref<8x128xf32, #tpu.memory_space<vmem>>, vector<8x128xf32>,
    return
  }
  func.func @transform_0(%arg0: i32) -> (i32, i32) {
    %c0_i32 = arith.constant 0 : i32
    %c0_i32_0 = arith.constant 0 : i32
    return %arg0, %c0_i32 : i32, i32
  }
  func.func @transform_1(%arg0: i32) -> (i32, i32) {
    %c0_i32 = arith.constant 0 : i32
    %c0_i32_0 = arith.constant 0 : i32
    %c0_i32_1 = arith.constant 0 : i32
    return %c0_i32, %c0_i32_0 : i32, i32
  }
  func.func @transform_2(%arg0: i32) -> (i32, i32) {
    %c0_i32 = arith.constant 0 : i32
    %c0_i32_0 = arith.constant 0 : i32
    %c0_i32_1 = arith.constant 0 : i32
    return %c0_i32, %c0_i32_0 : i32, i32
  }
  func.func @transform_3(%arg0: i32) -> (i32, i32) {
    %c0_i32 = arith.constant 0 : i32
    %c0_i32_0 = arith.constant 0 : i32
    %c0_i32_1 = arith.constant 0 : i32
    return %c0_i32, %c0_i32_0 : i32, i32
  }
  func.func @transform_4(%arg0: i32) -> (i32, i32) {
    %c0_i32 = arith.constant 0 : i32
    %c0_i32_0 = arith.constant 0 : i32
    %c0_i32_1 = arith.constant 0 : i32
    return %c0_i32, %c0_i32_0 : i32, i32
  }
  func.func @transform_5(%arg0: i32) -> (i32, i32) {
    %c0_i32 = arith.constant 0 : i32
    %c0_i32_0 = arith.constant 0 : i32
    %c0_i32_1 = arith.constant 0 : i32
    return %c0_i32, %c0_i32_0 : i32, i32
  }
  func.func @transform_6(%arg0: i32) -> (i32, i32) {
    %c0_i32 = arith.constant 0 : i32
    %c0_i32_0 = arith.constant 0 : i32
    %c0_i32_1 = arith.constant 0 : i32
    return %c0_i32, %c0_i32_0 : i32, i32
  }
  func.func @transform_7(%arg0: i32) -> (i32, i32) {
    %c0_i32 = arith.constant 0 : i32
    %c0_i32_0 = arith.constant 0 : i32
    %c0_i32_1 = arith.constant 0 : i32
    return %c0_i32, %c0_i32_0 : i32, i32
  }
  func.func @transform_8(%arg0: i32) -> (i32, i32) {
    %c0_i32 = arith.constant 0 : i32
    %c0_i32_0 = arith.constant 0 : i32
    %c0_i32_1 = arith.constant 0 : i32
    return %c0_i32, %c0_i32_0 : i32, i32
  }
  func.func @transform_9(%arg0: i32) -> (i32, i32) {
    %c0_i32 = arith.constant 0 : i32
    %c0_i32_0 = arith.constant 0 : i32
    %c0_i32_1 = arith.constant 0 : i32
    return %c0_i32, %c0_i32_0 : i32, i32
  }
  func.func @transform_10(%arg0: i32) -> (i32, i32) {
    %c0_i32 = arith.constant 0 : i32
    %c0_i32_0 = arith.constant 0 : i32
    %c0_i32_1 = arith.constant 0 : i32
    return %c0_i32, %c0_i32_0 : i32, i32
  }
  func.func @transform_11(%arg0: i32) -> (i32, i32) {
    %c0_i32 = arith.constant 0 : i32
    %c0_i32_0 = arith.constant 0 : i32
    return %arg0, %c0_i32 : i32, i32
  }
}

</mosaic_0001>

<bundles_post_ra>
// kernel: mlp_regressor_forward.1
= control target key start
LH: loop header
LB: loop body
LE: loop exit
PB: predicated region body
PF: predicated region fallthrough
CT: control target
= control target key end

     0   :  { %v627_v0 = vmov 0.0|0.0   ;;  %vm628_vm0 = vmmov 0   ;;  %v629_v4 = vmov 0.0   ;;  %v136_v37 = vlaneseq  ;;  %s892_s1 = inlined_call_operand.vmem [shape: f32[128,128], index: 1, kind: input, shape index: {}]   ;;  %s893_s0 = inlined_call_operand.vmem [shape: f32[8,128], index: 0, kind: input, shape index: {}]   ;;  %s894_s2 = inlined_call_operand.vmem [shape: f32[1,128], index: 2, kind: input, shape index: {}]   ;;  %s895_s5 = inlined_call_operand.vmem [shape: f32[128,128], index: 5, kind: input, shape index: {}]   ;;  %s896_s3 = inlined_call_operand.vmem [shape: f32[1,128], index: 3, kind: input, shape index: {}]   ;;  %s897_s4 = inlined_call_operand.vmem [shape: f32[1,128], index: 4, kind: input, shape index: {}]   ;;  %s898_s6 = inlined_call_operand.vmem [shape: f32[1,128], index: 6, kind: input, shape index: {}]   ;;  %s899_s9 = inlined_call_operand.vmem [shape: f32[128,128], index: 9, kind: input, shape index: {}]   ;;  %s900_s7 = inlined_call_operand.vmem [shape: f32[1,128], index: 7, kind: input, shape index: {}]   ;;  %s901_s8 = inlined_call_operand.vmem [shape: f32[1,128], index: 8, kind: input, shape index: {}]   ;;  %s902_s10 = inlined_call_operand.vmem [shape: f32[1,128], index: 10, kind: input, shape index: {}]   ;;  %s903_s11 = inlined_call_operand.vmem [shape: f32[8,128], index: 11, kind: output, shape index: {}]  }
   0x1   :  { %548 = vmatprep.subr.bf16.mxu0 %v627_v0  ;;  %v39_v1 = vld [vmem:[%s892_s1] sm:$0xff]  ;;  %v40_v2 = vld [vmem:[%s892_s1 + $0x8] sm:$0xff]  ;;  %v41_v3 = vld [vmem:[%s892_s1 + $0x10] sm:$0xff]  ;;  %475 = vmatprep.mubr.msk.f32.mxu0 %vm628_vm0, %v629_v4 }
   0x2   :  { %v549_v5 = vpack.c.bf16 %v40_v2, %v39_v1  ;;  %v42_v6 = vld [vmem:[%s892_s1 + $0x18] sm:$0xff]  ;;  %572 = vmatprep.subr.bf16.mxu1 %v627_v0  ;;  %510 = vmatprep.mubr.msk.f32.mxu1 %vm628_vm0, %v629_v4  ;;  %v43_v8 = vld [vmem:[%s892_s1 + $0x20] sm:$0xff]  ;;  %v44_v9 = vld [vmem:[%s892_s1 + $0x28] sm:$0xff]  ;;  %v771_v38 = vand.u32 127, %v136_v37 }
   0x3   :  { %v552_v7 = vpack.c.bf16 %v42_v6, %v41_v3  ;;  %v555_v10 = vpack.c.bf16 %v44_v9, %v43_v8  ;;  %v45_v11 = vld [vmem:[%s892_s1 + $0x30] sm:$0xff]  ;;  %v46_v12 = vld [vmem:[%s892_s1 + $0x38] sm:$0xff]  ;;  %v47_v14 = vld [vmem:[%s892_s1 + $0x40] sm:$0xff] }
   0x4   :  { %550 = vmatpush3.bf16.msra.mxu0 %v549_v5  ;;  %v558_v13 = vpack.c.bf16 %v46_v12, %v45_v11  ;;  %v48_v15 = vld [vmem:[%s892_s1 + $0x48] sm:$0xff]  ;;  %v49_v17 = vld [vmem:[%s892_s1 + $0x50] sm:$0xff]  ;;  %v50_v18 = vld [vmem:[%s892_s1 + $0x58] sm:$0xff]  ;;  %vm138_vm1 = vcmp.lt.s32.totalorder %v771_v38, 64  ;;  %vm261_vm2 = vcmp.lt.s32.totalorder %v771_v38, 32 }
   0x5   :  { %551 = vmatprep.subr.bf16.mxu0 %v627_v0  ;;  %v561_v16 = vpack.c.bf16 %v48_v15, %v47_v14  ;;  %v564_v19 = vpack.c.bf16 %v50_v18, %v49_v17  ;;  %v51_v20 = vld [vmem:[%s892_s1 + $0x60] sm:$0xff]  ;;  %v52_v21 = vld [vmem:[%s892_s1 + $0x68] sm:$0xff]  ;;  %v53_v23 = vld [vmem:[%s892_s1 + $0x70] sm:$0xff] }
   0x6   :  { %v567_v22 = vpack.c.bf16 %v52_v21, %v51_v20  ;;  %v54_v24 = vld [vmem:[%s892_s1 + $0x78] sm:$0xff]  ;;  %v38_v26 = vld [vmem:[%s893_s0] sm:$0xff]  ;;  %v165_v32 = vld [vmem:[%s895_s5 + $0x8] sm:$0xff] }
   0x7   :  { %v570_v25 = vpack.c.bf16 %v54_v24, %v53_v23  ;;  %v385_v27 = vld [vmem:[%s894_s2] ss:$0 sm:$0xff]  ;;  %v166_v33 = vld [vmem:[%s895_s5 + $0x10] sm:$0xff]  ;;  %v167_v35 = vld [vmem:[%s895_s5 + $0x18] sm:$0xff] }
   0x8   :  { %553 = vmatpush3.bf16.msra.mxu0 %v552_v7  ;;  %v164_v31 = vld [vmem:[%s895_s5] sm:$0xff]  ;;  %v576_v36 = vpack.c.bf16 %v167_v35, %v166_v33  ;;  %v169_v45 = vld [vmem:[%s895_s5 + $0x28] sm:$0xff]  ;;  %v170_v47 = vld [vmem:[%s895_s5 + $0x30] sm:$0xff] }
   0x9   :  { %554 = vmatprep.subr.bf16.mxu0 %v627_v0  ;;  %v573_v34 = vpack.c.bf16 %v165_v32, %v164_v31  ;;  %v168_v44 = vld [vmem:[%s895_s5 + $0x20] sm:$0xff]  ;;  %v171_v48 = vld [vmem:[%s895_s5 + $0x38] sm:$0xff]  ;;  %v173_v51 = vld [vmem:[%s895_s5 + $0x48] sm:$0xff] }
   0xa   :  { %v579_v46 = vpack.c.bf16 %v169_v45, %v168_v44  ;;  %v582_v49 = vpack.c.bf16 %v171_v48, %v170_v47  ;;  %v172_v50 = vld [vmem:[%s895_s5 + $0x40] sm:$0xff]  ;;  %v174_v53 = vld [vmem:[%s895_s5 + $0x50] sm:$0xff]  ;;  %v175_v54 = vld [vmem:[%s895_s5 + $0x58] sm:$0xff] }
   0xb   :  { %574 = vmatpush3.bf16.msra.mxu1 %v573_v34  ;;  %v585_v52 = vpack.c.bf16 %v173_v51, %v172_v50  ;;  %v588_v55 = vpack.c.bf16 %v175_v54, %v174_v53  ;;  %v176_v56 = vld [vmem:[%s895_s5 + $0x60] sm:$0xff]  ;;  %v177_v57 = vld [vmem:[%s895_s5 + $0x68] sm:$0xff]  ;;  %v178_v59 = vld [vmem:[%s895_s5 + $0x70] sm:$0xff] }
   0xc   :  { %556 = vmatpush3.bf16.msra.mxu0 %v555_v10  ;;  %575 = vmatprep.subr.bf16.mxu1 %v627_v0  ;;  %v591_v58 = vpack.c.bf16 %v177_v57, %v176_v56  ;;  %v179_v60 = vld [vmem:[%s895_s5 + $0x78] sm:$0xff]  ;;  %v386_v3 = vld [vmem:[%s896_s3] ss:$0 sm:$0xff]  ;;  %v288_v14 = vld [vmem:[%s899_s9 + $0x8] sm:$0xff] }
   0xd   :  { %557 = vmatprep.subr.bf16.mxu0 %v627_v0  ;;  %v594_v61 = vpack.c.bf16 %v179_v60, %v178_v59  ;;  %v387_v5 = vld [vmem:[%s897_s4] ss:$0 sm:$0xff]  ;;  %v289_v15 = vld [vmem:[%s899_s9 + $0x10] sm:$0xff]  ;;  %v290_v17 = vld [vmem:[%s899_s9 + $0x18] sm:$0xff] }
   0xe   :  { %v388_v9 = vld [vmem:[%s898_s6] ss:$0 sm:$0xff]  ;;  %v600_v18 = vpack.c.bf16 %v290_v17, %v289_v15  ;;  %v296_v31 = vld [vmem:[%s899_s9 + $0x48] sm:$0xff]  ;;  %v297_v33 = vld [vmem:[%s899_s9 + $0x50] sm:$0xff] }
   0xf   :  { %577 = vmatpush3.bf16.msra.mxu1 %v576_v36  ;;  %v291_v24 = vld [vmem:[%s899_s9 + $0x20] sm:$0xff]  ;;  %v298_v34 = vld [vmem:[%s899_s9 + $0x58] sm:$0xff]  ;;  %v300_v37 = vld [vmem:[%s899_s9 + $0x68] sm:$0xff] }
  0x10   :  { %559 = vmatpush3.bf16.msra.mxu0 %v558_v13  ;;  %578 = vmatprep.subr.bf16.mxu1 %v627_v0  ;;  %v287_v13 = vld [vmem:[%s899_s9] sm:$0xff]  ;;  %v612_v35 = vpack.c.bf16 %v298_v34, %v297_v33 }
  0x11   :  { %560 = vmatprep.subr.bf16.mxu0 %v627_v0  ;;  %v299_v36 = vld [vmem:[%s899_s9 + $0x60] sm:$0xff] }
  0x12   :  { %v615_v38 = vpack.c.bf16 %v300_v37, %v299_v36  ;;  %v390_v48 = vld [vmem:[%s901_s8] ss:$0 sm:$0xff] }
  0x13   :  { %580 = vmatpush3.bf16.msra.mxu1 %v579_v46  ;;  %v389_v46 = vld [vmem:[%s900_s7] ss:$0 sm:$0xff] }
  0x14   :  { %562 = vmatpush3.bf16.msra.mxu0 %v561_v16  ;;  %581 = vmatprep.subr.bf16.mxu1 %v627_v0  ;;  %v597_v16 = vpack.c.bf16 %v288_v14, %v287_v13 }
  0x15   :  { %563 = vmatprep.subr.bf16.mxu0 %v627_v0 }
  0x17   :  { %583 = vmatpush3.bf16.msra.mxu1 %v582_v49 }
  0x18   :  { %565 = vmatpush3.bf16.msra.mxu0 %v564_v19  ;;  %584 = vmatprep.subr.bf16.mxu1 %v627_v0 }
  0x19   :  { %566 = vmatprep.subr.bf16.mxu0 %v627_v0 }
  0x1b   :  { %586 = vmatpush3.bf16.msra.mxu1 %v585_v52 }
  0x1c   :  { %568 = vmatpush3.bf16.msra.mxu0 %v567_v22  ;;  %587 = vmatprep.subr.bf16.mxu1 %v627_v0 }
  0x1d   :  { %569 = vmatprep.subr.bf16.mxu0 %v627_v0 }
  0x1f   :  { %589 = vmatpush3.bf16.msra.mxu1 %v588_v55 }
  0x20   :  { %571 = vmatpush3.bf16.msra.mxu0 %v570_v25  ;;  %590 = vmatprep.subr.bf16.mxu1 %v627_v0  ;;  %v292_v25 = vld [vmem:[%s899_s9 + $0x28] sm:$0xff] }
  0x21   :  { %596 = vmatprep.subr.bf16.mxu0 %v627_v0 }
  0x23   :  { %476 = vmatmul.mubr.f32.vlgmr.msra.gmra.mrb[0].mxu0 %v38_v26  ;;  %592 = vmatpush3.bf16.msra.mxu1 %v591_v58  ;;  %v603_v26 = vpack.c.bf16 %v292_v25, %v291_v24 }
  0x24   :  { %545 = vmatprep.mubr.msk.f32.mxu0 %vm628_vm0, %v629_v4  ;;  %593 = vmatprep.subr.bf16.mxu1 %v627_v0 }
  0x25   :  { %598 = vmatpush3.bf16.msra.mxu0 %v597_v16 }
  0x26   :  { %599 = vmatprep.subr.bf16.mxu0 %v627_v0 }
  0x27   :  { %595 = vmatpush3.bf16.msra.mxu1 %v594_v61 }
  0x29   :  { %601 = vmatpush3.bf16.msra.mxu0 %v600_v18 }
  0x2a   :  { %602 = vmatprep.subr.bf16.mxu0 %v627_v0 }
  0x2d   :  { %604 = vmatpush3.bf16.msra.mxu0 %v603_v26 }
  0x2e   :  { %605 = vmatprep.subr.bf16.mxu0 %v627_v0 }
  0xf6   :  { %v128_v28 = vpop.f32.mrb[0].mxu0 }
  0xf7   :  { %v129_v29 = vadd.f32 %v385_v27, %v128_v28  ;;  %v477_v30 = vpop.f32.mrb[1].mxu0  ;;  %v293_v27 = vld [vmem:[%s899_s9 + $0x30] sm:$0xff]  ;;  %v294_v28 = vld [vmem:[%s899_s9 + $0x38] sm:$0xff] }
  0xf8   :  { %v295_v30 = vld [vmem:[%s899_s9 + $0x40] sm:$0xff] }
  0xf9   :  { %132 = vadd.xlane.f32.xlu0 %v129_v29  ;;  %v609_v32 = vpack.c.bf16 %v296_v31, %v295_v30 }
 0x186   :  { %v133_v39 = vpop.xlane.xlu0 %132 }
 0x187   :  { %v134_v40 = vmul.f32 0.015625, %v133_v39  ;;  %v301_v39 = vld [vmem:[%s899_s9 + $0x70] sm:$0xff] }
 0x189   :  { %v135_v41 = vsub.f32 %v129_v29, %v134_v40  ;;  %v606_v29 = vpack.c.bf16 %v294_v28, %v293_v27  ;;  %v302_v40 = vld [vmem:[%s899_s9 + $0x78] sm:$0xff] }
 0x18b   :  { %v139_v42 = vsel %vm138_vm1, %v135_v41, 0.0  ;;  %607 = vmatpush3.bf16.msra.mxu0 %v606_v29  ;;  %v618_v41 = vpack.c.bf16 %v302_v40, %v301_v39 }
 0x18c   :  { %v140_v43 = vmul.f32 %v139_v42, %v139_v42  ;;  %608 = vmatprep.subr.bf16.mxu0 %v627_v0 }
 0x18e   :  { %141 = vadd.xlane.f32.xlu0 %v140_v43 }
 0x18f   :  { %610 = vmatpush3.bf16.msra.mxu0 %v609_v32 }
 0x190   :  { %611 = vmatprep.subr.bf16.mxu0 %v627_v0 }
 0x193   :  { %613 = vmatpush3.bf16.msra.mxu0 %v612_v35 }
 0x194   :  { %614 = vmatprep.subr.bf16.mxu0 %v627_v0 }
 0x197   :  { %616 = vmatpush3.bf16.msra.mxu0 %v615_v38 }
 0x198   :  { %617 = vmatprep.subr.bf16.mxu0 %v627_v0  ;;  %v391_v0 = vld [vmem:[%s902_s10] ss:$0 sm:$0xff] }
 0x19b   :  { %619 = vmatpush3.bf16.msra.mxu0 %v618_v41 }
 0x21b   :  { %v142_v62 = vpop.xlane.xlu0 %141 }
 0x21c   :  { %v143_v63 = vmul.f32 0.015625, %v142_v62 }
 0x21e   :  { %v144_v1 = vadd.f32 1e-05, %v143_v63 }
 0x220   :  { %623 = vrsqrt.f32 %v144_v1 }
 0x22a   :  { %v624_v2 = vpop.eup %623 }
 0x22b   :  { %v146_v4 = vmul.f32 %v624_v2, %v139_v42 }
 0x22d   :  { %v154_v6 = vmul.f32 %v386_v3, %v146_v4 }
 0x22f   :  { %v162_v7 = vadd.f32 %v387_v5, %v154_v6 }
 0x231   :  { %v163_v8 = vmax.f32 %v162_v7, 0.0 }
 0x233   :  { %511 = vmatmul.mubr.f32.vlgmr.msra.gmra.mrb[0].mxu1 %v163_v8 }
 0x306   :  { %v253_v10 = vpop.f32.mrb[0].mxu1 }
 0x307   :  { %v254_v11 = vadd.f32 %v388_v9, %v253_v10  ;;  %v512_v12 = vpop.f32.mrb[1].mxu1 }
 0x309   :  { %257 = vadd.xlane.f32.xlu1 %v254_v11 }
 0x396   :  { %v258_v19 = vpop.xlane.xlu1 %257 }
 0x397   :  { %v259_v20 = vmul.f32 0.03125, %v258_v19 }
 0x399   :  { %v260_v21 = vsub.f32 %v254_v11, %v259_v20 }
 0x39b   :  { %v262_v22 = vsel %vm261_vm2, %v260_v21, 0.0 }
 0x39c   :  { %v263_v23 = vmul.f32 %v262_v22, %v262_v22 }
 0x39e   :  { %264 = vadd.xlane.f32.xlu1 %v263_v23 }
 0x42b   :  { %v265_v42 = vpop.xlane.xlu1 %264 }
 0x42c   :  { %v266_v43 = vmul.f32 0.03125, %v265_v42 }
 0x42e   :  { %v267_v44 = vadd.f32 1e-05, %v266_v43 }
 0x430   :  { %625 = vrsqrt.f32 %v267_v44 }
 0x43a   :  { %v626_v45 = vpop.eup %625 }
 0x43b   :  { %v269_v47 = vmul.f32 %v626_v45, %v262_v22 }
 0x43d   :  { %v277_v49 = vmul.f32 %v389_v46, %v269_v47 }
 0x43f   :  { %v285_v50 = vadd.f32 %v390_v48, %v277_v49 }
 0x441   :  { %v286_v51 = vmax.f32 %v285_v50, 0.0 }
 0x443   :  { %546 = vmatmul.mubr.f32.vlgmr.msra.gmra.mrb[2].mxu0 %v286_v51 }
 0x516   :  { %v376_v52 = vpop.f32.mrb[2].mxu0 }
 0x517   :  { %v377_v53 = vadd.f32 %v391_v0, %v376_v52  ;;  %v547_v54 = vpop.f32.mrb[3].mxu0 }
 0x519   :  { %380 = vst [vmem:[%s903_s11] sm:$0xff] %v377_v53 }

</bundles_post_ra>
